<compile_context>
chip_gen: v7x
topology: tpu7x:2x2x1
jax: 0.10.0
libtpu: 0.0.40
codegen_flags: <defaults>
</compile_context>

<pallas_src>
import functools

import jax
import jax.numpy as jnp
from jax.experimental import pallas as pl
from jax.experimental.pallas import tpu as pltpu

TEMP = 0.5   # self.temp in the PyTorch module; threshold sigmoid(a/temp)>0.5 == a>0 for temp>0
LANE = 128


def weekday_basis_kernel(sel_ref, theta_ref, tabb_ref, tabf_ref, wrow_ref,
                         w1_ref, b1_ref, w2_ref, b2_ref,
                         back_ref, fore_ref, h_ref, *, beta):
    sel = sel_ref[...]                                    # (1, TM)  int32
    theta = theta_ref[...]                                # (Tb, TM) f32

    # Reconstruct the per-column (per batch*dim) rolled/tiled weekday basis from
    # the resident table via a one-hot gather on the MXU (replaces two HBM streams).
    pdp = tabb_ref.shape[1]
    tm = sel.shape[1]
    row_ids = jax.lax.broadcasted_iota(jnp.int32, (pdp, tm), 0)
    onehot = (row_ids == sel).astype(jnp.float32)         # (PDp, TM)

    bb = jnp.dot(tabb_ref[...], onehot, preferred_element_type=jnp.float32)  # (Tb, TM)
    bf = jnp.dot(tabf_ref[...], onehot, preferred_element_type=jnp.float32)  # (Tf, TM)
    wt = jnp.dot(wrow_ref[...], onehot, preferred_element_type=jnp.float32)  # (1,  TM)

    # center both bases by the per-column mean of the *backward* basis
    mean_b = jnp.mean(bb, axis=0, keepdims=True)          # (1, TM)
    bb = bb - mean_b
    bf = bf - mean_b

    # center theta
    theta = theta - jnp.mean(theta, axis=0, keepdims=True)

    inp = 1.0 - (theta - bb) ** 2 / (theta * theta + 1e-6)

    # Inference (non-individual) path: fc1 -> tanh -> fc2 -> sigmoid
    z = jnp.dot(w1_ref[...], inp, preferred_element_type=jnp.float32) + b1_ref[...]  # (H, TM)
    z = jnp.tanh(z)
    z = jnp.dot(w2_ref[...], z, preferred_element_type=jnp.float32) + b2_ref[0]      # (1, TM)
    h = jax.nn.sigmoid(z)
    h_ref[...] = h                                        # KL finished in JAX wrapper

    # TODO(synk): reference parenthesization kept verbatim: h + 1e-8/(1-h+1e-8),
    #             not the usual logit log((h+1e-8)/(1-h+1e-8)).
    h_new = jnp.log(h + 1e-8 / (1.0 - h + 1e-8))
    alpha = (1.0 - beta) * h_new + beta * wt

    # eval-mode deterministic Bernoulli: sigmoid(alpha/TEMP) > 0.5  <=>  alpha > 0
    # TODO(synk): training-mode BinaryConcrete adds logistic noise (random);
    #             eval-mode thresholding is implemented here for determinism.
    sample = jnp.where(alpha > 0.0, 1.0, 0.0)

    # einsum('bkp,bpkt->bkt') with p == 1  ->  per-column scaling
    back_ref[...] = sample * bb
    fore_ref[...] = sample * bf


def weekday_basis_forward(theta, x, y_basis, params, beta):
    """theta: (B, dim, backcast)  x: (B, T, C) int32  y_basis: (period, dim)."""
    B, D, Tb = theta.shape
    Tf = int(params["forecast_size"])
    period, d2 = y_basis.shape
    assert d2 == D
    M = B * D

    # ---- tiny basis tables with every possible rolled+tiled column (built once) ----
    #   bf[b][d, t] = y_basis[(t      + idx[b] + 1) % period, d]
    #   bb[b][d, t] = y_basis[(t - Tb + idx[b] + 1) % period, d]
    s = jnp.arange(period)
    rb = jnp.mod(jnp.arange(Tb)[None, :] - Tb + s[:, None] + 1, period)   # (period, Tb)
    rf = jnp.mod(jnp.arange(Tf)[None, :] + s[:, None] + 1, period)        # (period, Tf)
    yb = y_basis.astype(jnp.float32)
    tab_b = jnp.transpose(yb[rb], (1, 0, 2)).reshape(Tb, period * D)      # [t, s*D+d]
    tab_f = jnp.transpose(yb[rf], (1, 0, 2)).reshape(Tf, period * D)
    wrow = jnp.tile(params["weight"].astype(jnp.float32), (period,)).reshape(1, period * D)

    PD = period * D
    PDp = ((PD + LANE - 1) // LANE) * LANE
    tab_b = jnp.pad(tab_b, ((0, 0), (0, PDp - PD)))
    tab_f = jnp.pad(tab_f, ((0, 0), (0, PDp - PD)))
    wrow = jnp.pad(wrow, ((0, 0), (0, PDp - PD)))

    # ---- lane-dense transposed activations: M on the 128-lane axis -----------------
    TM = 512
    m_lane = ((M + LANE - 1) // LANE) * LANE
    if m_lane <= TM:
        TM = m_lane
    M_pad = ((M + TM - 1) // TM) * TM
    grid = (M_pad // TM,)

    idx = x[:, -1, 0].astype(jnp.int32)                                   # weekday per batch
    sel = (idx[:, None] * D + jnp.arange(D, dtype=jnp.int32)[None, :]).reshape(1, M)
    sel = jnp.pad(sel, ((0, 0), (0, M_pad - M)))

    theta_t = jnp.transpose(theta.astype(jnp.float32), (2, 0, 1)).reshape(Tb, M)
    theta_t = jnp.pad(theta_t, ((0, 0), (0, M_pad - M)))

    w1t = params["w1"].astype(jnp.float32).T                              # (H, Tb)
    H = w1t.shape[0]
    b1 = params["b1"].astype(jnp.float32).reshape(H, 1)
    w2t = params["w2"].astype(jnp.float32).T                              # (1, H)
    b2 = params["b2"].astype(jnp.float32).reshape(1)                      # SMEM scalar

    kernel = functools.partial(weekday_basis_kernel, beta=float(beta))
    back_t, fore_t, h_t = pl.pallas_call(
        kernel,
        grid=grid,
        in_specs=[
            pl.BlockSpec((1, TM), lambda i: (0, i)),             # sel        (streamed)
            pl.BlockSpec((Tb, TM), lambda i: (0, i)),            # theta      (streamed)
            pl.BlockSpec((Tb, PDp), lambda i: (0, 0)),           # tab_b      (resident)
            pl.BlockSpec((Tf, PDp), lambda i: (0, 0)),           # tab_f      (resident)
            pl.BlockSpec((1, PDp), lambda i: (0, 0)),            # weight row (resident)
            pl.BlockSpec((H, Tb), lambda i: (0, 0)),             # fc1 weight (resident)
            pl.BlockSpec((H, 1), lambda i: (0, 0)),              # fc1 bias   (resident)
            pl.BlockSpec((1, H), lambda i: (0, 0)),              # fc2 weight (resident)
            pl.BlockSpec(memory_space=pltpu.MemorySpace.SMEM),   # fc2 bias   (scalar)
        ],
        out_specs=(
            pl.BlockSpec((Tb, TM), lambda i: (0, i)),
            pl.BlockSpec((Tf, TM), lambda i: (0, i)),
            pl.BlockSpec((1, TM), lambda i: (0, i)),
        ),
        out_shape=(
            jax.ShapeDtypeStruct((Tb, M_pad), jnp.float32),
            jax.ShapeDtypeStruct((Tf, M_pad), jnp.float32),
            jax.ShapeDtypeStruct((1, M_pad), jnp.float32),
        ),
        compiler_params=pltpu.CompilerParams(
            dimension_semantics=("parallel",),
            vmem_limit_bytes=32 * 1024 * 1024,
        ),
    )(sel, theta_t, tab_b, tab_f, wrow, w1t, b1, w2t, b2)

    # ---- finish the KL (mean_log2 couples every row, so it lives in JAX) -----------
    h = h_t[0, :M]
    log2 = jnp.log((1.0 - h + 1e-5) * 2.0)
    mean_log2 = jnp.mean(log2)
    kl = jnp.mean(h * jnp.log((h + 1e-5) * 2.0) + (1.0 - h) * mean_log2)

    backcast = jnp.transpose(back_t[:, :M]).reshape(B, D, Tb)
    forecast = jnp.transpose(fore_t[:, :M]).reshape(B, D, Tf)
    return backcast, forecast, kl


if __name__ == "__main__":
    key = jax.random.PRNGKey(0)
    B, D = 2, 7                        # batch_size, dim (weekdays)
    backcast_size, forecast_size = 16, 8
    hidden = backcast_size // 2        # Inference hidden = backcast // 2
    beta = 0.3

    k1, k2, k3, k4, k5, k6 = jax.random.split(key, 6)
    theta = jax.random.normal(k1, (B, D, backcast_size), dtype=jnp.float32)
    x = jax.random.randint(k2, (B, 3, 1), 0, 7, dtype=jnp.int32)   # weekday index in x[:, -1, 0]
    y_basis = jnp.eye(7, dtype=jnp.float32)[:, :D]                 # y[0]: (period=7, dim)

    # deterministic parameter init (PyTorch Linear-style uniform bounds)
    bound1 = 1.0 / (backcast_size ** 0.5)
    bound2 = 1.0 / (hidden ** 0.5)
    params = {
        "forecast_size": forecast_size,
        "w1": jax.random.uniform(k3, (backcast_size, hidden), jnp.float32, -bound1, bound1),
        "b1": jax.random.uniform(k4, (hidden,), jnp.float32, -bound1, bound1),
        "w2": jax.random.uniform(k5, (hidden, 1), jnp.float32, -bound2, bound2),
        "b2": jax.random.uniform(k6, (1,), jnp.float32, -bound2, bound2),
        "weight": jnp.zeros((D,), jnp.float32),    # nn.Parameter(torch.zeros(dim))
    }

    backcast, forecast, kl = weekday_basis_forward(theta, x, y_basis, params, beta)
    jax.block_until_ready((backcast, forecast, kl))
    assert backcast.shape == (B, D, backcast_size)
    assert forecast.shape == (B, D, forecast_size)
    assert kl.shape == ()
    print("KERNEL_OK")
</pallas_src>

<mosaic_0001>
module attributes {stable_mosaic.version = 11 : i64} {
  func.func @weekday_basis_kernel(%arg0: i32, %arg1: memref<1x128xi32, #tpu.memory_space<vmem>>, %arg2: memref<16x128xf32, #tpu.memory_space<vmem>>, %arg3: memref<16x128xf32, #tpu.memory_space<vmem>>, %arg4: memref<8x128xf32, #tpu.memory_space<vmem>>, %arg5: memref<1x128xf32, #tpu.memory_space<vmem>>, %arg6: memref<8x16xf32, #tpu.memory_space<vmem>>, %arg7: memref<8x1xf32, #tpu.memory_space<vmem>>, %arg8: memref<1x8xf32, #tpu.memory_space<vmem>>, %arg9: memref<1xf32, #tpu.memory_space<smem>>, %arg10: memref<16x128xf32, #tpu.memory_space<vmem>>, %arg11: memref<8x128xf32, #tpu.memory_space<vmem>>, %arg12: memref<1x128xf32, #tpu.memory_space<vmem>>) attributes {dimension_semantics = [#tpu.dimension_semantics<parallel>], iteration_bounds = array<i64: 1>, scalar_prefetch = 0 : i64, scratch_operands = 0 : i64, tpu.core_type = #tpu.core_type<tc>, window_params = [{transform_indices = @transform_0, window_bounds = array<i64: 1, 128>}, {transform_indices = @transform_1, window_bounds = array<i64: 16, 128>}, {pipeline_mode = #tpu.pipeline_mode<synchronous>, transform_indices = @transform_2, window_bounds = array<i64: 16, 128>}, {pipeline_mode = #tpu.pipeline_mode<synchronous>, transform_indices = @transform_3, window_bounds = array<i64: 8, 128>}, {pipeline_mode = #tpu.pipeline_mode<synchronous>, transform_indices = @transform_4, window_bounds = array<i64: 1, 128>}, {pipeline_mode = #tpu.pipeline_mode<synchronous>, transform_indices = @transform_5, window_bounds = array<i64: 8, 16>}, {pipeline_mode = #tpu.pipeline_mode<synchronous>, transform_indices = @transform_6, window_bounds = array<i64: 8, 1>}, {pipeline_mode = #tpu.pipeline_mode<synchronous>, transform_indices = @transform_7, window_bounds = array<i64: 1, 8>}, {transform_indices = @transform_8, window_bounds = array<i64: 1>}, {transform_indices = @transform_9, window_bounds = array<i64: 16, 128>}, {transform_indices = @transform_10, window_bounds = array<i64: 8, 128>}, {transform_indices = @transform_11, window_bounds = array<i64: 1, 128>}]} {
    %c0 = arith.constant 0 : index
    %c0_0 = arith.constant 0 : index
    %0 = vector.load %arg1[%c0, %c0_0] : memref<1x128xi32, #tpu.memory_space<vmem>>, vector<1x128xi32>
    %c0_1 = arith.constant 0 : index
    %c0_2 = arith.constant 0 : index
    %1 = vector.load %arg2[%c0_1, %c0_2] : memref<16x128xf32, #tpu.memory_space<vmem>>, vector<16x128xf32>
    %2 = tpu.iota {dimensions = array<i32: 0>} : vector<128x128xi32>
    %3 = vector.broadcast %0 : vector<1x128xi32> to vector<128x128xi32>
    %4 = arith.cmpi eq, %2, %3 : vector<128x128xi32>
    %5 = arith.extui %4 : vector<128x128xi1> to vector<128x128xi32>
    %6 = arith.sitofp %5 : vector<128x128xi32> to vector<128x128xf32>
    %c0_3 = arith.constant 0 : index
    %c0_4 = arith.constant 0 : index
    %7 = vector.load %arg3[%c0_3, %c0_4] : memref<16x128xf32, #tpu.memory_space<vmem>>, vector<16x128xf32>
    %cst = arith.constant dense<0.000000e+00> : vector<16x128xf32>
    %8 = tpu.matmul %7, %6, %cst {dimension_numbers = #tpu.dot_dimension_numbers<[1], [0], [0], [1], [0, 0, 1, 1], [], []>} : vector<16x128xf32>, vector<128x128xf32>, vector<16x128xf32> -> vector<16x128xf32>
    %c0_5 = arith.constant 0 : index
    %c0_6 = arith.constant 0 : index
    %9 = vector.load %arg4[%c0_5, %c0_6] : memref<8x128xf32, #tpu.memory_space<vmem>>, vector<8x128xf32>
    %cst_7 = arith.constant dense<0.000000e+00> : vector<8x128xf32>
    %10 = tpu.matmul %9, %6, %cst_7 {dimension_numbers = #tpu.dot_dimension_numbers<[1], [0], [0], [1], [0, 0, 1, 1], [], []>} : vector<8x128xf32>, vector<128x128xf32>, vector<8x128xf32> -> vector<8x128xf32>
    %c0_8 = arith.constant 0 : index
    %c0_9 = arith.constant 0 : index
    %11 = vector.load %arg5[%c0_8, %c0_9] : memref<1x128xf32, #tpu.memory_space<vmem>>, vector<1x128xf32>
    %cst_10 = arith.constant dense<0.000000e+00> : vector<1x128xf32>
    %12 = tpu.matmul %11, %6, %cst_10 {dimension_numbers = #tpu.dot_dimension_numbers<[1], [0], [0], [1], [0, 0, 1, 1], [], []>} : vector<1x128xf32>, vector<128x128xf32>, vector<1x128xf32> -> vector<1x128xf32>
    %cst_11 = arith.constant dense<0.000000e+00> : vector<128xf32>
    %13 = vector.multi_reduction <add>, %8, %cst_11 [0] : vector<16x128xf32> to vector<128xf32>
    %14 = vector.shape_cast %13 : vector<128xf32> to vector<1x128xf32>
    %cst_12 = arith.constant 1.600000e+01 : f32
    %15 = vector.broadcast %cst_12 : f32 to vector<1x128xf32>
    %16 = arith.divf %14, %15 : vector<1x128xf32>
    %17 = vector.broadcast %16 : vector<1x128xf32> to vector<16x128xf32>
    %18 = arith.subf %8, %17 : vector<16x128xf32>
    %19 = vector.broadcast %16 : vector<1x128xf32> to vector<8x128xf32>
    %20 = arith.subf %10, %19 : vector<8x128xf32>
    %cst_13 = arith.constant dense<0.000000e+00> : vector<128xf32>
    %21 = vector.multi_reduction <add>, %1, %cst_13 [0] : vector<16x128xf32> to vector<128xf32>
    %22 = vector.shape_cast %21 : vector<128xf32> to vector<1x128xf32>
    %cst_14 = arith.constant 1.600000e+01 : f32
    %23 = vector.broadcast %cst_14 : f32 to vector<1x128xf32>
    %24 = arith.divf %22, %23 : vector<1x128xf32>
    %25 = vector.broadcast %24 : vector<1x128xf32> to vector<16x128xf32>
    %26 = arith.subf %1, %25 : vector<16x128xf32>
    %27 = arith.subf %26, %18 : vector<16x128xf32>
    %28 = arith.mulf %27, %27 : vector<16x128xf32>
    %29 = arith.mulf %26, %26 : vector<16x128xf32>
    %cst_15 = arith.constant 9.99999997E-7 : f32
    %30 = vector.broadcast %cst_15 : f32 to vector<16x128xf32>
    %31 = arith.addf %29, %30 : vector<16x128xf32>
    %32 = arith.divf %28, %31 : vector<16x128xf32>
    %cst_16 = arith.constant 1.000000e+00 : f32
    %33 = vector.broadcast %cst_16 : f32 to vector<16x128xf32>
    %34 = arith.subf %33, %32 : vector<16x128xf32>
    %c0_17 = arith.constant 0 : index
    %c0_18 = arith.constant 0 : index
    %35 = vector.load %arg6[%c0_17, %c0_18] : memref<8x16xf32, #tpu.memory_space<vmem>>, vector<8x16xf32>
    %cst_19 = arith.constant dense<0.000000e+00> : vector<8x128xf32>
    %36 = tpu.matmul %35, %34, %cst_19 {dimension_numbers = #tpu.dot_dimension_numbers<[1], [0], [0], [1], [0, 0, 1, 1], [], []>} : vector<8x16xf32>, vector<16x128xf32>, vector<8x128xf32> -> vector<8x128xf32>
    %c0_20 = arith.constant 0 : index
    %c0_21 = arith.constant 0 : index
    %37 = vector.load %arg7[%c0_20, %c0_21] : memref<8x1xf32, #tpu.memory_space<vmem>>, vector<8x1xf32>
    %38 = vector.broadcast %37 : vector<8x1xf32> to vector<8x128xf32>
    %39 = arith.addf %36, %38 : vector<8x128xf32>
    %40 = math.tanh %39 : vector<8x128xf32>
    %c0_22 = arith.constant 0 : index
    %c0_23 = arith.constant 0 : index
    %41 = vector.load %arg8[%c0_22, %c0_23] : memref<1x8xf32, #tpu.memory_space<vmem>>, vector<1x8xf32>
    %cst_24 = arith.constant dense<0.000000e+00> : vector<1x128xf32>
    %42 = tpu.matmul %41, %40, %cst_24 {dimension_numbers = #tpu.dot_dimension_numbers<[1], [0], [0], [1], [0, 0, 1, 1], [], []>} : vector<1x8xf32>, vector<8x128xf32>, vector<1x128xf32> -> vector<1x128xf32>
    %c0_25 = arith.constant 0 : index
    %43 = memref.load %arg9[%c0_25] : memref<1xf32, #tpu.memory_space<smem>>
    %44 = vector.broadcast %43 : f32 to vector<1x128xf32>
    %45 = arith.addf %42, %44 : vector<1x128xf32>
    %46 = arith.negf %45 : vector<1x128xf32>
    %47 = math.exp %46 : vector<1x128xf32>
    %cst_26 = arith.constant 1.000000e+00 : f32
    %48 = vector.broadcast %cst_26 : f32 to vector<1x128xf32>
    %49 = arith.addf %48, %47 : vector<1x128xf32>
    %50 = arith.divf %48, %49 : vector<1x128xf32>
    %c0_27 = arith.constant 0 : index
    %c0_28 = arith.constant 0 : index
    %51 = vector.load %arg12[%c0_27, %c0_28] : memref<1x128xf32, #tpu.memory_space<vmem>>, vector<1x128xf32>
    tpu.vector_store %arg12[%c0_27, %c0_28], %50 {strides = array<i32>} : memref<1x128xf32, #tpu.memory_space<vmem>>, vector<1x128xf32>,
    %cst_29 = arith.constant 1.000000e+00 : f32
    %52 = vector.broadcast %cst_29 : f32 to vector<1x128xf32>
    %53 = arith.subf %52, %50 : vector<1x128xf32>
    %cst_30 = arith.constant 9.99999993E-9 : f32
    %54 = vector.broadcast %cst_30 : f32 to vector<1x128xf32>
    %55 = arith.addf %53, %54 : vector<1x128xf32>
    %cst_31 = arith.constant 9.99999993E-9 : f32
    %56 = vector.broadcast %cst_31 : f32 to vector<1x128xf32>
    %57 = arith.divf %56, %55 : vector<1x128xf32>
    %58 = arith.addf %50, %57 : vector<1x128xf32>
    %59 = math.log %58 : vector<1x128xf32>
    %cst_32 = arith.constant 0.699999988 : f32
    %60 = vector.broadcast %cst_32 : f32 to vector<1x128xf32>
    %61 = arith.mulf %60, %59 : vector<1x128xf32>
    %cst_33 = arith.constant 3.000000e-01 : f32
    %62 = vector.broadcast %cst_33 : f32 to vector<1x128xf32>
    %63 = arith.mulf %62, %12 : vector<1x128xf32>
    %64 = arith.addf %61, %63 : vector<1x128xf32>
    %cst_34 = arith.constant 0.000000e+00 : f32
    %65 = vector.broadcast %cst_34 : f32 to vector<1x128xf32>
    %66 = arith.cmpf ogt, %64, %65 : vector<1x128xf32>
    %cst_35 = arith.constant 1.000000e+00 : f32
    %cst_36 = arith.constant 0.000000e+00 : f32
    %67 = vector.broadcast %cst_35 : f32 to vector<1x128xf32>
    %68 = vector.broadcast %cst_36 : f32 to vector<1x128xf32>
    %69 = arith.select %66, %67, %68 : vector<1x128xi1>, vector<1x128xf32>
    %70 = vector.broadcast %69 : vector<1x128xf32> to vector<16x128xf32>
    %71 = arith.mulf %70, %18 : vector<16x128xf32>
    %c0_37 = arith.constant 0 : index
    %c0_38 = arith.constant 0 : index
    %72 = vector.load %arg10[%c0_37, %c0_38] : memref<16x128xf32, #tpu.memory_space<vmem>>, vector<16x128xf32>
    tpu.vector_store %arg10[%c0_37, %c0_38], %71 {strides = array<i32>} : memref<16x128xf32, #tpu.memory_space<vmem>>, vector<16x128xf32>,
    %73 = vector.broadcast %69 : vector<1x128xf32> to vector<8x128xf32>
    %74 = arith.mulf %73, %20 : vector<8x128xf32>
    %c0_39 = arith.constant 0 : index
    %c0_40 = arith.constant 0 : index
    %75 = vector.load %arg11[%c0_39, %c0_40] : memref<8x128xf32, #tpu.memory_space<vmem>>, vector<8x128xf32>
    tpu.vector_store %arg11[%c0_39, %c0_40], %74 {strides = array<i32>} : memref<8x128xf32, #tpu.memory_space<vmem>>, vector<8x128xf32>,
    return
  }
  func.func @transform_0(%arg0: i32) -> (i32, i32) {
    %c0_i32 = arith.constant 0 : i32
    %c0_i32_0 = arith.constant 0 : i32
    return %c0_i32, %arg0 : i32, i32
  }
  func.func @transform_1(%arg0: i32) -> (i32, i32) {
    %c0_i32 = arith.constant 0 : i32
    %c0_i32_0 = arith.constant 0 : i32
    return %c0_i32, %arg0 : i32, i32
  }
  func.func @transform_2(%arg0: i32) -> (i32, i32) {
    %c0_i32 = arith.constant 0 : i32
    %c0_i32_0 = arith.constant 0 : i32
    %c0_i32_1 = arith.constant 0 : i32
    return %c0_i32, %c0_i32_0 : i32, i32
  }
  func.func @transform_3(%arg0: i32) -> (i32, i32) {
    %c0_i32 = arith.constant 0 : i32
    %c0_i32_0 = arith.constant 0 : i32
    %c0_i32_1 = arith.constant 0 : i32
    return %c0_i32, %c0_i32_0 : i32, i32
  }
  func.func @transform_4(%arg0: i32) -> (i32, i32) {
    %c0_i32 = arith.constant 0 : i32
    %c0_i32_0 = arith.constant 0 : i32
    %c0_i32_1 = arith.constant 0 : i32
    return %c0_i32, %c0_i32_0 : i32, i32
  }
  func.func @transform_5(%arg0: i32) -> (i32, i32) {
    %c0_i32 = arith.constant 0 : i32
    %c0_i32_0 = arith.constant 0 : i32
    %c0_i32_1 = arith.constant 0 : i32
    return %c0_i32, %c0_i32_0 : i32, i32
  }
  func.func @transform_6(%arg0: i32) -> (i32, i32) {
    %c0_i32 = arith.constant 0 : i32
    %c0_i32_0 = arith.constant 0 : i32
    %c0_i32_1 = arith.constant 0 : i32
    return %c0_i32, %c0_i32_0 : i32, i32
  }
  func.func @transform_7(%arg0: i32) -> (i32, i32) {
    %c0_i32 = arith.constant 0 : i32
    %c0_i32_0 = arith.constant 0 : i32
    %c0_i32_1 = arith.constant 0 : i32
    return %c0_i32, %c0_i32_0 : i32, i32
  }
  func.func @transform_8(%arg0: i32) -> i32 {
    %c0_i32 = arith.constant 0 : i32
    %c0_i32_0 = arith.constant 0 : i32
    return %c0_i32 : i32
  }
  func.func @transform_9(%arg0: i32) -> (i32, i32) {
    %c0_i32 = arith.constant 0 : i32
    %c0_i32_0 = arith.constant 0 : i32
    return %c0_i32, %arg0 : i32, i32
  }
  func.func @transform_10(%arg0: i32) -> (i32, i32) {
    %c0_i32 = arith.constant 0 : i32
    %c0_i32_0 = arith.constant 0 : i32
    return %c0_i32, %arg0 : i32, i32
  }
  func.func @transform_11(%arg0: i32) -> (i32, i32) {
    %c0_i32 = arith.constant 0 : i32
    %c0_i32_0 = arith.constant 0 : i32
    return %c0_i32, %arg0 : i32, i32
  }
}

</mosaic_0001>

<bundles_post_ra>
// kernel: tpu_custom_call.1
= control target key start
LH: loop header
LB: loop body
LE: loop exit
PB: predicated region body
PF: predicated region fallthrough
CT: control target
= control target key end

     0   :  { %18 = vsyncpa [#allocation4], 0  ;;  %s1508_s0 = inlined_call_operand.hbm [shape: s32[1,128], index: 0, kind: input, shape index: {}]   ;;  %s1509_s1 = inlined_call_operand.vmem [shape: f32[16,128], index: 1, kind: input, shape index: {}]   ;;  %s1510_s2 = inlined_call_operand.hbm [shape: f32[16,128], index: 2, kind: input, shape index: {}]   ;;  %s1511_s3 = inlined_call_operand.vmem [shape: f32[8,128], index: 3, kind: input, shape index: {}]   ;;  %s1512_s4 = inlined_call_operand.vmem [shape: f32[1,128], index: 4, kind: input, shape index: {}]   ;;  %s1513_s5 = inlined_call_operand.hbm [shape: f32[8,16], index: 5, kind: input, shape index: {}]   ;;  %s1514_s6 = inlined_call_operand.vmem [shape: f32[8,1], index: 6, kind: input, shape index: {}]   ;;  %s1515_s7 = inlined_call_operand.vmem [shape: f32[1,8], index: 7, kind: input, shape index: {}]   ;;  %s1516_s8 = inlined_call_operand.<no memory space> [shape: f32[1], index: 8, kind: input, shape index: {}]   ;;  %s1517_s9 = inlined_call_operand.hbm [shape: f32[16,128], index: 9, kind: output, shape index: {0}]   ;;  %s1518_s10 = inlined_call_operand.hbm [shape: f32[8,128], index: 10, kind: output, shape index: {1}]   ;;  %s1519_s11 = inlined_call_operand.hbm [shape: f32[1,128], index: 11, kind: output, shape index: {2}]  }
   0x1   :  { %19 = vsyncpa [#allocation7], 0 }
   0x2   :  { %20 = vsyncpa [#allocation5], 0 }
   0x3   :  { %21 = vsyncpa [#allocation11], 0  ;;  %s1128_s17 = smov [#allocation6]   ;;  %s988_s21 = scalar_lea.hbm %s1510_s2, 256 }
   0x4   :  { %s39_s18 = sshll.u32 %s1128_s17, 4  ;;  %p989_p0 = scmp.ne.s32.totalorder %s1510_s2, %s988_s21  ;;  %s40_s18 = int_to_ptr.vmem [resolvable:$true] %s39_s18 }
   0x5   :  { %p992_p1 = scmp.lt.u32.totalorder %s988_s21, %s1510_s2 }
   0x7   :  { %p994_p2 = pnand %p992_p1, %p989_p0 }
   0x9   :  { %997 = shalt.err (!%p994_p2)
}
   0xa   :  { %s998_s26 = scalar_lea.vmem %s40_s18, 256  ;;  %p1003_p4 = scmp.lt.s32.totalorder %s40_s18, %s40_s18 }
   0xb   :  { %p999_p3 = scmp.ne.s32.totalorder %s40_s18, %s998_s26  ;;  %p1004_p5 = scmp.lt.s32.totalorder %s998_s26, %s998_s26 }
   0xd   :  { %p1005_p6 = por %p1004_p5, %p1003_p4 }
   0xf   :  { %p1006_p7 = pnand %p1005_p6, %p999_p3 }
  0x11   :  { %1009 = shalt.err (!%p1006_p7)
}
  0x12   :  { %s1129_s27 = smov 128   ;;  %s1130_s28 = smov 8  }
  0x13   :  { %45 = dma.hbm_to_vmem [thread:$0]  %s1510_s2, 256, %s40_s18, [#allocation7], %s1129_s27, %s1129_s27, %s1130_s28  }
  0x14   :  { %s1131_s12 = smov [#allocation3]   ;;  %s1132_s14 = smov [#allocation8]  }
  0x15   :  { %s28_s13 = sshll.u32 %s1131_s12, 4  ;;  %s56_s15 = sshll.u32 %s1132_s14, 4  ;;  %s29_s13 = int_to_ptr.vmem [resolvable:$true] %s28_s13  ;;  %s57_s15 = int_to_ptr.vmem [resolvable:$true] %s56_s15 }
  0x16   :  { %s1010_s19 = scalar_lea.hbm %s1508_s0, 16 }
  0x17   :  { %p1011_p8 = scmp.ne.s32.totalorder %s1508_s0, %s1010_s19  ;;  %p1014_p9 = scmp.lt.u32.totalorder %s1010_s19, %s1508_s0 }
  0x19   :  { %p1016_p10 = pnand %p1014_p9, %p1011_p8 }
  0x1b   :  { %1019 = shalt.err (!%p1016_p10)
}
  0x1c   :  { %s1020_s2 = scalar_lea.vmem %s29_s13, 16  ;;  %s1024_s18 = scalar_lea.vmem %s29_s13, 32 }
  0x1d   :  { %p1021_p11 = scmp.ne.s32.totalorder %s29_s13, %s1020_s2  ;;  %p1025_p12 = scmp.lt.s32.totalorder %s29_s13, %s29_s13 }
  0x1e   :  { %p1026_p13 = scmp.lt.s32.totalorder %s1024_s18, %s1020_s2 }
  0x20   :  { %p1027_p0 = por %p1026_p13, %p1025_p12 }
  0x22   :  { %p1028_p1 = pnand %p1027_p0, %p1021_p11 }
  0x24   :  { %1031 = shalt.err (!%p1028_p1)
}
  0x25   :  { %31 = dma.hbm_to_vmem [thread:$0]  %s1508_s0, 16, %s29_s13, [#allocation4]  }
  0x26   :  { %s1032_s30 = scalar_lea.hbm %s1513_s5, 128 }
  0x27   :  { %p1033_p2 = scmp.ne.s32.totalorder %s1513_s5, %s1032_s30  ;;  %p1036_p3 = scmp.lt.u32.totalorder %s1032_s30, %s1513_s5 }
  0x29   :  { %p1038_p4 = pnand %p1036_p3, %p1033_p2 }
  0x2b   :  { %1041 = shalt.err (!%p1038_p4)
}
  0x2c   :  { %s1042_s19 = scalar_lea.vmem %s57_s15, 128  ;;  %p1047_p6 = scmp.lt.s32.totalorder %s57_s15, %s57_s15 }
  0x2d   :  { %p1043_p5 = scmp.ne.s32.totalorder %s57_s15, %s1042_s19  ;;  %p1048_p7 = scmp.lt.s32.totalorder %s1042_s19, %s1042_s19 }
  0x2f   :  { %p1049_p8 = por %p1048_p7, %p1047_p6 }
  0x31   :  { %p1050_p9 = pnand %p1049_p8, %p1043_p5 }
  0x33   :  { %1053 = shalt.err (!%p1050_p9)
}
  0x34   :  { %59 = dma.hbm_to_vmem [thread:$0]  %s1513_s5, 128, %s57_s15, [#allocation7]  }
  0x35   :  { %1120 = dma.done.wait [#allocation4], 16  }
  0x36   :  { %1121 = vsyncadd [#allocation4], 4294967280 }
  0x37   :  { %1122 = dma.done.wait [#allocation7], 384  }
  0x38   :  { %1123 = vsyncadd [#allocation7], 4294966912  ;;  %v78_v0 = vlaneseq  ;;  %v1133_v1 = vmov 0.0|0.0   ;;  %vm1134_vm0 = vmmov 0   ;;  %v1135_v3 = vmov 0.0   ;;  %v147_v10 = vld [vmem:[#allocation6] sm:$0xff] }
  0x39   :  { %909 = vmatprep.subr.bf16.mxu1 %v1133_v1  ;;  %827 = vmatprep.mubr.msk.f32.mxu1 %vm1134_vm0, %v1135_v3  ;;  %v635_v9 = vld [vmem:[#allocation3] ss:$0 sm:$0xff]  ;;  %v1136_v12 = vmov 1.0|1.0   ;;  %v148_v31 = vld [vmem:[#allocation6 + $0x8] sm:$0xff]  ;;  %v1137_v33 = vmov 0  }
  0x3a   :  { %v1241_v2 = vshrl.u32 %v78_v0, 7  ;;  %792 = vmatprep.mubr.f32.mxu0 %v147_v10  ;;  %v224_v30 = vld [vmem:[%s1511_s3] sm:$0xff]  ;;  %973 = vset.pattern.permute.xlu0 %v1137_v33  ;;  %v77_v35 = vld [vmem:[%s1509_s1 + $0x8] sm:$0xff]  ;;  %s1140_s30 = smov [#allocation12]  }
  0x3b   :  { %v403_v32 = vld [vmem:[%s1514_s6] sm:$0xff]  ;;  %s618_s12 = sshll.u32 %s1140_s30, 4  ;;  %s1456_s12 = int_to_ptr.vmem [resolvable:$true] %s618_s12 }
  0x3c   :  { %v80_v4 = vadd.s32 8, %v1241_v2  ;;  %v81_v5 = vadd.s32 16, %v1241_v2  ;;  %v82_v6 = vadd.s32 24, %v1241_v2  ;;  %v83_v7 = vadd.s32 32, %v1241_v2  ;;  %406 = vperm.xlu0 %973, %v403_v32   ;;  %v76_v34 = vld [vmem:[%s1509_s1] sm:$0xff] }
  0x3d   :  { %v84_v8 = vadd.s32 40, %v1241_v2  ;;  %vm99_vm1 = vcmp.eq.s32.totalorder %v1241_v2, %v635_v9  ;;  %v85_v14 = vadd.s32 48, %v1241_v2  ;;  %v86_v15 = vadd.s32 56, %v1241_v2 }
  0x3e   :  { %vm100_vm2 = vcmp.eq.s32.totalorder %v80_v4, %v635_v9  ;;  %vm101_vm3 = vcmp.eq.s32.totalorder %v81_v5, %v635_v9  ;;  %vm102_vm4 = vcmp.eq.s32.totalorder %v82_v6, %v635_v9  ;;  %vm103_vm7 = vcmp.eq.s32.totalorder %v83_v7, %v635_v9 }
  0x3f   :  { %vm1251_vm5 = vmpackc.low %vm100_vm2, %vm99_vm1  ;;  %vm104_vm8 = vcmp.eq.s32.totalorder %v84_v8, %v635_v9  ;;  %vm105_vm10 = vcmp.eq.s32.totalorder %v85_v14, %v635_v9  ;;  %vm106_vm11 = vcmp.eq.s32.totalorder %v86_v15, %v635_v9  ;;  %v87_v17 = vadd.s32 64, %v1241_v2  ;;  %v402_v14 = vld [vmem:[#allocation8] sm:$0xff]  ;;  %v295_v15 = vld [vmem:[%s1512_s4] sm:$0x1]  ;;  %s1138_s4 = smov [#allocation10]  }
  0x40   :  { %878 = vmatprep.subr.msk.bf16.mxu0 %vm1251_vm5, %v1136_v12  ;;  %vm1258_vm6 = vmpackc.low %vm102_vm4, %vm101_vm3  ;;  %911 = vmatpush3.bf16.msk.msra.mxu1 %vm1251_vm5, %v1136_v12  ;;  %v88_v18 = vadd.s32 72, %v1241_v2  ;;  %v89_v20 = vadd.s32 80, %v1241_v2  ;;  %v90_v21 = vadd.s32 88, %v1241_v2  ;;  %v91_v23 = vadd.s32 96, %v1241_v2 }
  0x41   :  { %880 = vmatpush3.bf16.msk.msra.mxu0 %vm1251_vm5, %v1136_v12  ;;  %912 = vmatprep.subr.bf16.mxu1 %v1133_v1  ;;  %vm1274_vm9 = vmpackc.low %vm104_vm8, %vm103_vm7  ;;  %vm107_vm13 = vcmp.eq.s32.totalorder %v87_v17, %v635_v9  ;;  %v92_v24 = vadd.s32 104, %v1241_v2  ;;  %v93_v26 = vadd.s32 112, %v1241_v2  ;;  %v94_v27 = vadd.s32 120, %v1241_v2 }
  0x42   :  { %882 = vmatprep.subr.msk.bf16.mxu0 %vm1258_vm6, %v1136_v12  ;;  %vm1290_vm12 = vmpackc.low %vm106_vm11, %vm105_vm10  ;;  %vm108_vm14 = vcmp.eq.s32.totalorder %v88_v18, %v635_v9  ;;  %vm109_vm1 = vcmp.eq.s32.totalorder %v89_v20, %v635_v9  ;;  %vm110_vm2 = vcmp.eq.s32.totalorder %v90_v21, %v635_v9  ;;  %vm111_vm4 = vcmp.eq.s32.totalorder %v91_v23, %v635_v9  ;;  %v484_v20 = vld [vmem:[%s1515_s7] sm:$0x1]  ;;  %s608_s7 = sshll.u32 %s1138_s4, 4  ;;  %s609_s7 = int_to_ptr.vmem [resolvable:$true] %s608_s7 }
  0x43   :  { %vm1306_vm15 = vmpackc.low %vm108_vm14, %vm107_vm13  ;;  %vm112_vm7 = vcmp.eq.s32.totalorder %v92_v24, %v635_v9  ;;  %vm113_vm10 = vcmp.eq.s32.totalorder %v93_v26, %v635_v9  ;;  %vm114_vm11 = vcmp.eq.s32.totalorder %v94_v27, %v635_v9  ;;  %v378_v36 = vadd.f32 %v77_v35, %v76_v34  ;;  %s1054_s14 = scalar_lea.vmem %s609_s7, 128  ;;  %p1059_p11 = scmp.lt.s32.totalorder %s609_s7, %s609_s7 }
  0x44   :  { %914 = vmatpush3.bf16.msk.msra.mxu1 %vm1258_vm6, %v1136_v12  ;;  %vm1322_vm3 = vmpackc.low %vm110_vm2, %vm109_vm1  ;;  %v486_v24 = vstv %s1516_s8  ;;  %s1139_s8 = smov [#allocation9]   ;;  %p1055_p10 = scmp.ne.s32.totalorder %s609_s7, %s1054_s14 }
  0x45   :  { %884 = vmatpush3.bf16.msk.msra.mxu0 %vm1258_vm6, %v1136_v12  ;;  %915 = vmatprep.subr.bf16.mxu1 %v1133_v1  ;;  %vm1338_vm8 = vmpackc.low %vm112_vm7, %vm111_vm4  ;;  %v379_v37 = vrot.slane %v378_v36, 4  ;;  %s595_s29 = sshll.u32 %s1139_s8, 4  ;;  %p1060_p12 = scmp.lt.s32.totalorder %s1054_s14, %s1054_s14  ;;  %s1454_s29 = int_to_ptr.vmem [resolvable:$true] %s595_s29 }
  0x46   :  { %886 = vmatprep.subr.msk.bf16.mxu0 %vm1274_vm9, %v1136_v12  ;;  %vm1352_vm13 = vmpackc.low %vm114_vm11, %vm113_vm10 }
  0x47   :  { %v380_v38 = vadd.f32 %v379_v37, %v378_v36  ;;  %p1061_p13 = por %p1060_p12, %p1059_p11 }
  0x48   :  { %917 = vmatpush3.bf16.msk.msra.mxu1 %vm1274_vm9, %v1136_v12 }
  0x49   :  { %888 = vmatpush3.bf16.msk.msra.mxu0 %vm1274_vm9, %v1136_v12  ;;  %918 = vmatprep.subr.bf16.mxu1 %v1133_v1  ;;  %v381_v39 = vrot.slane %v380_v38, 2  ;;  %p1062_p0 = pnand %p1061_p13, %p1055_p10 }
  0x4a   :  { %890 = vmatprep.subr.msk.bf16.mxu0 %vm1290_vm12, %v1136_v12 }
  0x4b   :  { %v382_v40 = vadd.f32 %v381_v39, %v380_v38 }
  0x4c   :  { %920 = vmatpush3.bf16.msk.msra.mxu1 %vm1290_vm12, %v1136_v12 }
  0x4d   :  { %892 = vmatpush3.bf16.msk.msra.mxu0 %vm1290_vm12, %v1136_v12  ;;  %921 = vmatprep.subr.bf16.mxu1 %v1133_v1  ;;  %v383_v41 = vrot.slane %v382_v40, 1 }
  0x4e   :  { %894 = vmatprep.subr.msk.bf16.mxu0 %vm1306_vm15, %v1136_v12 }
  0x4f   :  { %v384_v42 = vadd.f32 %v383_v41, %v382_v40 }
  0x50   :  { %923 = vmatpush3.bf16.msk.msra.mxu1 %vm1306_vm15, %v1136_v12 }
  0x51   :  { %896 = vmatpush3.bf16.msk.msra.mxu0 %vm1306_vm15, %v1136_v12  ;;  %924 = vmatprep.subr.bf16.mxu1 %v1133_v1  ;;  %v385_v43 = vmul.f32 0.0625, %v384_v42  ;;  %v582_v42 = vsub.s32 0, %v1241_v2 }
  0x52   :  { %898 = vmatprep.subr.msk.bf16.mxu0 %vm1322_vm3, %v1136_v12 }
  0x53   :  { %v386_v44 = vsub.f32 %v76_v34, %v385_v43  ;;  %v387_v45 = vsub.f32 %v77_v35, %v385_v43 }
  0x54   :  { %926 = vmatpush3.bf16.msk.msra.mxu1 %vm1322_vm3, %v1136_v12 }
  0x55   :  { %900 = vmatpush3.bf16.msk.msra.mxu0 %vm1322_vm3, %v1136_v12  ;;  %927 = vmatprep.subr.bf16.mxu1 %v1133_v1  ;;  %v392_v51 = vmul.f32 %v386_v44, %v386_v44  ;;  %v393_v52 = vmul.f32 %v387_v45, %v387_v45 }
  0x56   :  { %902 = vmatprep.subr.msk.bf16.mxu0 %vm1338_vm8, %v1136_v12 }
  0x57   :  { %v394_v55 = vadd.f32 1e-06, %v392_v51  ;;  %v395_v56 = vadd.f32 1e-06, %v393_v52 }
  0x58   :  { %929 = vmatpush3.bf16.msk.msra.mxu1 %vm1338_vm8, %v1136_v12 }
  0x59   :  { %904 = vmatpush3.bf16.msk.msra.mxu0 %vm1338_vm8, %v1136_v12  ;;  %930 = vmatprep.subr.bf16.mxu1 %v1133_v1  ;;  %974 = vrcp.f32 %v394_v55 }
  0x5a   :  { %906 = vmatprep.subr.msk.bf16.mxu0 %vm1352_vm13, %v1136_v12  ;;  %976 = vrcp.f32 %v395_v56 }
  0x5c   :  { %932 = vmatpush3.bf16.msk.msra.mxu1 %vm1352_vm13, %v1136_v12 }
  0x5d   :  { %908 = vmatpush3.bf16.msk.msra.mxu0 %vm1352_vm13, %v1136_v12  ;;  %957 = vmatprep.subr.bf16.mxu1 %v1133_v1 }
  0x5e   :  { %933 = vmatprep.subr.bf16.mxu0 %v1133_v1 }
  0x5f   :  { %828 = vmatmul.mubr.f32.vlgmr.msra.gmra.mrb[0].mxu1 %v224_v30 }
  0x60   :  { %793 = vmatmul.mubr.f32.vlgmr.msra.gmra.mrb[0].mxu0 %v148_v31  ;;  %869 = vmatprep.mubr.msk.f32.mxu1 %vm1134_vm0, %v1135_v3 }
  0x61   :  { %935 = vmatpush3.bf16.msk.msra.mxu0 %vm1251_vm5, %v1136_v12  ;;  %862 = vmatprep.mubr.msk.f32.mxu0 %vm1134_vm0, %v1135_v3  ;;  %vm409_vm5 = vcmask 130048  }
  0x62   :  { %936 = vmatprep.subr.bf16.mxu0 %v1133_v1 }
  0x65   :  { %938 = vmatpush3.bf16.msk.msra.mxu0 %vm1258_vm6, %v1136_v12  ;;  %vm487_vm6 = vcmask 64512  }
  0x66   :  { %939 = vmatprep.subr.bf16.mxu0 %v1133_v1 }
  0x69   :  { %941 = vmatpush3.bf16.msk.msra.mxu0 %vm1274_vm9, %v1136_v12 }
  0x6a   :  { %942 = vmatprep.subr.bf16.mxu0 %v1133_v1 }
  0x6d   :  { %944 = vmatpush3.bf16.msk.msra.mxu0 %vm1290_vm12, %v1136_v12 }
  0x6e   :  { %945 = vmatprep.subr.bf16.mxu0 %v1133_v1 }
  0x71   :  { %947 = vmatpush3.bf16.msk.msra.mxu0 %vm1306_vm15, %v1136_v12 }
  0x72   :  { %948 = vmatprep.subr.bf16.mxu0 %v1133_v1 }
  0x75   :  { %950 = vmatpush3.bf16.msk.msra.mxu0 %vm1322_vm3, %v1136_v12 }
  0x76   :  { %951 = vmatprep.subr.bf16.mxu0 %v1133_v1 }
  0x79   :  { %953 = vmatpush3.bf16.msk.msra.mxu0 %vm1338_vm8, %v1136_v12 }
  0x7a   :  { %954 = vmatprep.subr.bf16.mxu0 %v1133_v1  ;;  %v975_v1 = vpop.eup %974 }
  0x7b   :  { %v977_v6 = vpop.eup %976 }
  0x7d   :  { %956 = vmatpush3.bf16.msk.msra.mxu0 %vm1352_vm13, %v1136_v12 }
  0x80   :  { %863 = vmatmul.mubr.f32.vlgmr.msra.gmra.mrb[2].mxu0 %v295_v15 }
  0xbb   :  { %v407_v16 = vpop.permute.xlu0 %406 }
 0x132   :  { %v1421_v46 = vpop.f32.mrb[0].mxu1 }
 0x133   :  { %v794_v47 = vpop.f32.mrb[0].mxu0  ;;  %v829_v48 = vpop.f32.mrb[1].mxu1 }
 0x134   :  { %v215_v49 = vpop.f32.mrb[1].mxu0 }
 0x135   :  { %v366_v50 = vadd.f32 %v794_v47, %v215_v49 }
 0x137   :  { %v367_v53 = vrot.slane %v366_v50, 4 }
 0x139   :  { %v368_v54 = vadd.f32 %v367_v53, %v366_v50 }
 0x13b   :  { %v369_v57 = vrot.slane %v368_v54, 2 }
 0x13d   :  { %v370_v58 = vadd.f32 %v369_v57, %v368_v54 }
 0x13f   :  { %v371_v59 = vrot.slane %v370_v58, 1 }
 0x141   :  { %v372_v60 = vadd.f32 %v371_v59, %v370_v58 }
 0x143   :  { %v1423_v61 = vmul.f32 0.0625, %v372_v60 }
 0x145   :  { %v1426_v62 = vsub.f32 %v215_v49, %v1423_v61  ;;  %v1429_v63 = vsub.f32 %v794_v47, %v1423_v61  ;;  %v377_v0 = vsub.f32 %v1421_v46, %v1423_v61 }
 0x147   :  { %v388_v4 = vsub.f32 %v386_v44, %v1426_v62  ;;  %v389_v5 = vsub.f32 %v387_v45, %v1429_v63 }
 0x149   :  { %v390_v7 = vmul.f32 %v388_v4, %v388_v4  ;;  %v391_v8 = vmul.f32 %v389_v5, %v389_v5 }
 0x14b   :  { %v397_v9 = vmul.f32 %v975_v1, %v390_v7  ;;  %v399_v10 = vmul.f32 %v977_v6, %v391_v8 }
 0x14d   :  { %v400_v11 = vsub.f32 1.0, %v397_v9  ;;  %v401_v12 = vsub.f32 1.0, %v399_v10 }
 0x14f   :  { %v958_v13 = vpack.c.bf16 %v401_v12, %v400_v11 }
 0x151   :  { %959 = vmatpush3.bf16.msra.mxu1 %v958_v13 }
 0x152   :  { %872 = vmatprep.subr.mxu1 %v1135_v3 }
 0x153   :  { %v362_v22 = vpop.f32.mrb[2].mxu0 }
 0x154   :  { %870 = vmatmul.mubr.msk.f32.vlgmr.msra.gmra.mrb[2].mxu1 %vm409_vm5, %v402_v14  ;;  %v864_v23 = vpop.f32.mrb[3].mxu0  ;;  %v576_v39 = vmul.f32 0.3, %v362_v22 }
 0x155   :  { %874 = vmatprep.mubr.msk.f32.mxu1 %vm1134_vm0, %v1135_v3 }
 0x227   :  { %v479_v17 = vpop.f32.mrb[2].mxu1 }
 0x228   :  { %v480_v18 = vadd.f32 %v479_v17, %v407_v16  ;;  %v871_v19 = vpop.f32.mrb[3].mxu1 }
 0x22a   :  { %978 = vtanh.f32 %v480_v18 }
 0x234   :  { %v979_v21 = vpop.eup %978 }
 0x235   :  { %873 = vmatpush3.msra.mxu1 %v979_v21 }
 0x236   :  { %875 = vmatmul.mubr.msk.f32.vlgmr.msra.gmra.mrb[4].mxu1 %vm487_vm6, %v484_v20 }
 0x309   :  { %v557_v25 = vpop.f32.mrb[4].mxu1 }
 0x30a   :  { %v558_v26 = vadd.f32 %v557_v25, %v486_v24  ;;  %v876_v27 = vpop.f32.mrb[5].mxu1 }
 0x30c   :  { %v702_v28 = vmul.f32 -1.442695, %v558_v26 }
 0x30e   :  { %980 = vpow2.f32 %v702_v28 }
 0x318   :  { %v981_v29 = vpop.eup %980 }
 0x319   :  { %v564_v30 = vadd.f32 1.0, %v981_v29 }
 0x31b   :  { %982 = vrcp.f32 %v564_v30 }
 0x325   :  { %v983_v31 = vpop.eup %982 }
 0x326   :  { %567 = vst [vmem:[#allocation12] sm:$0x1] %v983_v31  ;;  %v568_v32 = vsub.f32 1.0, %v983_v31 }
 0x328   :  { %v569_v33 = vadd.f32 1e-08, %v568_v32 }
 0x32a   :  { %984 = vrcp.f32 %v569_v33 }
 0x334   :  { %v985_v34 = vpop.eup %984 }
 0x335   :  { %v571_v35 = vmul.f32 1e-08, %v985_v34 }
 0x337   :  { %v572_v36 = vadd.f32 %v983_v31, %v571_v35 }
 0x339   :  { %986 = vlog2.f32 %v572_v36 }
 0x343   :  { %v987_v37 = vpop.eup %986 }
 0x344   :  { %v574_v38 = vmul.f32 0.6931472, %v987_v37 }
 0x346   :  { %v575_v40 = vmul.f32 0.7, %v574_v38 }
 0x348   :  { %v577_v41 = vadd.f32 %v576_v39, %v575_v40 }
 0x34a   :  { %vm578_vm0 = vcmp.gt.f32.partialorder %v577_v41, 0.0 }
 0x34b   :  { %v579_v43 = vsel %vm578_vm0, 1.0, %v1135_v3 }
 0x34c   :  { %v583_v44 = vrot.slane %v579_v43, %v582_v42 }
 0x34e   :  { %v588_v45 = vmul.f32 %v583_v44, %v377_v0  ;;  %v584_v47 = vmul.f32 %v583_v44, %v1426_v62  ;;  %v585_v48 = vmul.f32 %v583_v44, %v1429_v63 }
 0x350   :  { %589 = vst [vmem:[#allocation10] sm:$0xff] %v588_v45  ;;  %586 = vst [vmem:[#allocation9] sm:$0xff] %v584_v47 }
 0x351   :  { %587 = vst [vmem:[#allocation9 + $0x8] sm:$0xff] %v585_v48 }
 0x352   :  { %1065 = shalt.err (!%p1062_p0)
}
 0x353   :  { %s1066_s19 = scalar_lea.hbm %s1518_s10, 128 }
 0x354   :  { %p1067_p1 = scmp.ne.s32.totalorder %s1518_s10, %s1066_s19  ;;  %p1070_p2 = scmp.lt.u32.totalorder %s1066_s19, %s1518_s10 }
 0x356   :  { %p1072_p3 = pnand %p1070_p2, %p1067_p1 }
 0x358   :  { %1075 = shalt.err (!%p1072_p3)
}
 0x359   :  { %611 = dma.vmem_to_hbm [thread:$0]  %s609_s7, 128, %s1518_s10, [#allocation11]  }
 0x35a   :  { %s1076_s21 = scalar_lea.vmem %s1454_s29, 256  ;;  %p1081_p5 = scmp.lt.s32.totalorder %s1454_s29, %s1454_s29 }
 0x35b   :  { %p1077_p4 = scmp.ne.s32.totalorder %s1454_s29, %s1076_s21  ;;  %p1082_p6 = scmp.lt.s32.totalorder %s1076_s21, %s1076_s21 }
 0x35d   :  { %p1083_p7 = por %p1082_p6, %p1081_p5 }
 0x35f   :  { %p1084_p8 = pnand %p1083_p7, %p1077_p4 }
 0x361   :  { %1087 = shalt.err (!%p1084_p8)
}
 0x362   :  { %s1088_s2 = scalar_lea.hbm %s1517_s9, 256 }
 0x363   :  { %p1089_p9 = scmp.ne.s32.totalorder %s1517_s9, %s1088_s2  ;;  %p1092_p10 = scmp.lt.u32.totalorder %s1088_s2, %s1517_s9 }
 0x365   :  { %p1094_p11 = pnand %p1092_p10, %p1089_p9 }
 0x367   :  { %1097 = shalt.err (!%p1094_p11)
}
 0x368   :  { %601 = dma.vmem_to_hbm [thread:$0]  %s1454_s29, 256, %s1517_s9, [#allocation5], %s1129_s27, %s1129_s27, %s1130_s28  }
 0x369   :  { %s1098_s26 = scalar_lea.vmem %s1456_s12, 16  ;;  %s1102_s4 = scalar_lea.vmem %s1456_s12, 32 }
 0x36a   :  { %p1099_p12 = scmp.ne.s32.totalorder %s1456_s12, %s1098_s26  ;;  %p1103_p13 = scmp.lt.s32.totalorder %s1456_s12, %s1456_s12 }
 0x36b   :  { %p1104_p0 = scmp.lt.s32.totalorder %s1102_s4, %s1098_s26 }
 0x36d   :  { %p1105_p1 = por %p1104_p0, %p1103_p13 }
 0x36f   :  { %p1106_p2 = pnand %p1105_p1, %p1099_p12 }
 0x371   :  { %1109 = shalt.err (!%p1106_p2)
}
 0x372   :  { %s1110_s30 = scalar_lea.hbm %s1519_s11, 16 }
 0x373   :  { %p1111_p3 = scmp.ne.s32.totalorder %s1519_s11, %s1110_s30  ;;  %p1114_p4 = scmp.lt.u32.totalorder %s1110_s30, %s1519_s11 }
 0x375   :  { %p1116_p5 = pnand %p1114_p4, %p1111_p3 }
 0x377   :  { %1119 = shalt.err (!%p1116_p5)
}
 0x378   :  { %621 = dma.vmem_to_hbm [thread:$0]  %s1456_s12, 16, %s1519_s11, [#allocation11]  }
 0x379   :  { %1124 = dma.done.wait [#allocation5], 256  }
 0x37a   :  { %1125 = vsyncadd [#allocation5], 4294967040 }
 0x37b   :  { %1126 = dma.done.wait [#allocation11], 144  }
 0x37c   :  { %1127 = vsyncadd [#allocation11], 4294967152 }
 0x37d   :  { %631 = vsyncpa [#allocation4], 1 }
 0x37e   :  { %632 = vsyncpa [#allocation7], 1 }
 0x37f   :  { %633 = vsyncpa [#allocation5], 1 }
 0x380   :  { %634 = vsyncpa [#allocation11], 1 }

</bundles_post_ra>
